<compile_context>
chip_gen: v7x
topology: tpu7x:2x2x1
jax: 0.10.0
libtpu: 0.0.40
codegen_flags: <defaults>
</compile_context>

<pallas_src>
import jax
import jax.numpy as jnp
from jax.experimental import pallas as pl
from jax.experimental.pallas import tpu as pltpu


def _round_up(x, m):
    return (x + m - 1) // m * m


def _make_conv_block_kernel(W, HWp, Ck, Bt):
    """W: image width; HWp: lane-padded H*W; Ck: padded Cin; Bt: batch elems per grid step."""

    def kernel(x_ref, w_ref, mask_ref, bias_ref, o_ref, patch_ref):
        # x_ref:     (Bt, Ck, HWp)     compute dtype; NCHW activation flattened over H*W
        # w_ref:     (Cout, 9*Ck)      compute dtype; BN-scale folded, K index = tap*Ck + cin
        # mask_ref:  (9, 1, HWp)       compute dtype; 0/1 in-bounds mask per 3x3 tap (padding=1)
        # bias_ref:  (Cout, 1)         f32; folded BN bias
        # o_ref:     (Bt, Cout, HWp)   f32
        # patch_ref: (9*Ck, Bt*HWp)    VMEM scratch; im2row-style stacked taps
        for b in range(Bt):                          # static unroll over folded batch elems
            xb = x_ref[b]                            # (Ck, HWp)
            for tap in range(9):                     # static unroll over the 3x3 taps
                dy, dx = divmod(tap, 3)
                src_off = (dy - 1) * W + (dx - 1)    # patch[p] = x[p + src_off] when in-bounds
                shift = (-src_off) % HWp
                patch = pltpu.roll(xb, shift, axis=1) if shift else xb
                if tap != 4:                         # center tap is always in-bounds
                    # Input-side masking: Ck*HWp elems per tap (not Cout*HWp post-matmul).
                    patch = patch * mask_ref[tap]
                patch_ref[pl.ds(tap * Ck, Ck), pl.ds(b * HWp, HWp)] = patch
        # One MXU matmul: K = 9*Ck, free dim = Bt*HWp, f32 accumulation.
        acc = jnp.dot(w_ref[...], patch_ref[...], preferred_element_type=jnp.float32)
        # TODO(synk): Dropout2d is identity in eval mode; training-mode channel dropout and
        # BatchNorm batch-statistics updates are intentionally not implemented here.
        out = jnp.maximum(acc + bias_ref[...], 0.0)  # folded BN bias + ReLU, all f32
        for b in range(Bt):
            o_ref[b] = out[:, b * HWp:(b + 1) * HWp].astype(o_ref.dtype)

    return kernel


def conv_block_forward(x_nchw, conv_w, bn_gamma, bn_beta, bn_mean, bn_var, eps=1e-5,
                       *, compute_dtype=jnp.bfloat16, batch_tile=None):
    """ConvBlock.forward (eval): conv3x3(s=1, p=1, bias=False) -> BN -> Dropout2d(id) -> ReLU.

    x_nchw: (N, Cin, H, W); conv_w: (Cout, Cin, 3, 3) PyTorch OIHW. Returns (N, Cout, H, W) f32.
    """
    N, Cin, H, W = x_nchw.shape
    Cout = conv_w.shape[0]
    HW = H * W
    HWp = _round_up(HW, 128)                              # lane-dense (unmasked vst) outputs
    # Pad channels so every per-tap scratch store is sublane-tile aligned for compute_dtype.
    sub = 8 * (4 // jnp.dtype(compute_dtype).itemsize)    # f32: 8 rows, bf16: 16 rows
    Ck = _round_up(Cin, sub)

    # Fold BatchNorm (inference) into the conv weights and a per-channel bias.
    scale = (bn_gamma / jnp.sqrt(bn_var + eps)).astype(jnp.float32)                     # (Cout,)
    bias = (bn_beta.astype(jnp.float32) - bn_mean.astype(jnp.float32) * scale).reshape(Cout, 1)
    w_folded = conv_w.astype(jnp.float32) * scale[:, None, None, None]                  # OIHW
    if Ck != Cin:
        w_folded = jnp.pad(w_folded, ((0, 0), (0, Ck - Cin), (0, 0), (0, 0)))
    # (Cout, Ck, 3, 3) -> (Cout, 3, 3, Ck) -> (Cout, 9*Ck): K index = (ky*3+kx)*Ck + cin.
    w_stacked = jnp.transpose(w_folded, (0, 2, 3, 1)).reshape(Cout, 9 * Ck).astype(compute_dtype)

    # Per-tap validity masks over flattened spatial positions (the implicit padding=1 zeros).
    ry = jnp.arange(H)[:, None]
    cx = jnp.arange(W)[None, :]
    mask_list = []
    for dy in range(3):
        for dx in range(3):
            m = ((ry + dy - 1 >= 0) & (ry + dy - 1 < H) &
                 (cx + dx - 1 >= 0) & (cx + dx - 1 < W)).reshape(1, HW)
            mask_list.append(m)
    masks = jnp.stack(mask_list, axis=0)                  # (9, 1, HW) bool
    if HWp != HW:
        masks = jnp.pad(masks, ((0, 0), (0, 0), (0, HWp - HW)))
    masks = masks.astype(compute_dtype)                   # 0/1 exact in bf16

    # Layout-preserving flatten; channel / lane padding only when needed (no-op at prod sizes).
    x_flat = x_nchw.reshape(N, Cin, HW)
    if Ck != Cin:
        x_flat = jnp.pad(x_flat, ((0, 0), (0, Ck - Cin), (0, 0)))
    if HWp != HW:
        x_flat = jnp.pad(x_flat, ((0, 0), (0, 0), (0, HWp - HW)))
    x_flat = x_flat.astype(compute_dtype)

    if batch_tile is None:
        # Fold batch elements into one grid step for small images (amortize ~0.35us/step grid
        # overhead, widen the MXU free dim), but keep >= 2 grid steps when possible.
        batch_tile = 1
        for bt in range(2, N + 1):
            if N % bt == 0 and bt * HWp <= 4096 and N // bt >= 2:
                batch_tile = bt
    assert N % batch_tile == 0, "batch_tile must divide N"
    Bt = batch_tile

    kernel = _make_conv_block_kernel(W, HWp, Ck, Bt)
    # TODO(synk): for very large H*W (e.g. 224x224) on v7x's 64 MiB VMEM, add an HW-tiling grid
    # axis with halo handling; full-image blocks here are sized for v5e/v6e-class VMEM.
    out_flat = pl.pallas_call(
        kernel,
        out_shape=jax.ShapeDtypeStruct((N, Cout, HWp), jnp.float32),
        grid_spec=pltpu.PrefetchScalarGridSpec(
            num_scalar_prefetch=0,
            grid=(N // Bt,),
            in_specs=[
                pl.BlockSpec((Bt, Ck, HWp), lambda g: (g, 0, 0)),
                pl.BlockSpec((Cout, 9 * Ck), lambda g: (0, 0)),
                pl.BlockSpec((9, 1, HWp), lambda g: (0, 0, 0)),
                pl.BlockSpec((Cout, 1), lambda g: (0, 0)),
            ],
            out_specs=pl.BlockSpec((Bt, Cout, HWp), lambda g: (g, 0, 0)),
            scratch_shapes=[pltpu.VMEM((9 * Ck, Bt * HWp), compute_dtype)],
        ),
        compiler_params=pltpu.CompilerParams(
            dimension_semantics=("parallel",),
            vmem_limit_bytes=64 * 1024 * 1024,
        ),
    )(x_flat, w_stacked, masks, bias)

    return out_flat[:, :, :HW].reshape(N, Cout, H, W)


if __name__ == "__main__":
    key = jax.random.PRNGKey(0)
    k_x, k_w, k_g, k_b, k_m, k_v = jax.random.split(key, 6)

    N, Cin, Cout, H, W = 2, 4, 8, 16, 16

    x = jax.random.normal(k_x, (N, Cin, H, W), dtype=jnp.float32)
    conv_w = jax.random.normal(k_w, (Cout, Cin, 3, 3), dtype=jnp.float32) * 0.1
    bn_gamma = 1.0 + 0.1 * jax.random.normal(k_g, (Cout,), dtype=jnp.float32)
    bn_beta = 0.1 * jax.random.normal(k_b, (Cout,), dtype=jnp.float32)
    bn_mean = 0.1 * jax.random.normal(k_m, (Cout,), dtype=jnp.float32)
    bn_var = jnp.abs(1.0 + 0.1 * jax.random.normal(k_v, (Cout,), dtype=jnp.float32))

    # Pure-JAX reference (same eval-mode semantics as ConvBlock.forward).
    ref = jax.lax.conv_general_dilated(
        x, conv_w, window_strides=(1, 1), padding=((1, 1), (1, 1)),
        dimension_numbers=("NCHW", "OIHW", "NCHW"))
    r_scale = (bn_gamma / jnp.sqrt(bn_var + 1e-5)).reshape(1, Cout, 1, 1)
    r_bias = (bn_beta - bn_mean * bn_gamma / jnp.sqrt(bn_var + 1e-5)).reshape(1, Cout, 1, 1)
    ref = jnp.maximum(ref * r_scale + r_bias, 0.0)

    # 1) f32 operands, one image per grid step (2 grid steps): tight tolerance.
    out_f32 = conv_block_forward(x, conv_w, bn_gamma, bn_beta, bn_mean, bn_var,
                                 compute_dtype=jnp.float32, batch_tile=1)
    jax.block_until_ready(out_f32)
    assert jnp.allclose(out_f32, ref, atol=1e-4, rtol=1e-4), "f32 mismatch vs reference"

    # 2) f32 with two images folded into the lane dim (1 grid step): verifies the per-image
    #    roll+mask handling has no cross-image leakage, still at tight tolerance.
    out_fold = conv_block_forward(x, conv_w, bn_gamma, bn_beta, bn_mean, bn_var,
                                  compute_dtype=jnp.float32, batch_tile=2)
    jax.block_until_ready(out_fold)
    assert jnp.allclose(out_fold, ref, atol=1e-4, rtol=1e-4), "batch-folded mismatch vs reference"

    # 3) bf16 operands (f32 accumulate + f32 epilogue): the production default path.
    out_bf16 = conv_block_forward(x, conv_w, bn_gamma, bn_beta, bn_mean, bn_var,
                                  compute_dtype=jnp.bfloat16, batch_tile=2)
    jax.block_until_ready(out_bf16)
    assert jnp.allclose(out_bf16, ref, atol=5e-2, rtol=5e-2), "bf16 mismatch vs reference"

    print("KERNEL_OK")
</pallas_src>

<mosaic_0001>
module attributes {stable_mosaic.version = 11 : i64} {
  func.func @kernel(%arg0: i32, %arg1: memref<1x8x256xf32, #tpu.memory_space<vmem>>, %arg2: memref<8x72xf32, #tpu.memory_space<vmem>>, %arg3: memref<9x1x256xf32, #tpu.memory_space<vmem>>, %arg4: memref<8x1xf32, #tpu.memory_space<vmem>>, %arg5: memref<1x8x256xf32, #tpu.memory_space<vmem>>, %arg6: memref<72x256xf32, #tpu.memory_space<vmem>>) attributes {dimension_semantics = [#tpu.dimension_semantics<parallel>], iteration_bounds = array<i64: 2>, scalar_prefetch = 0 : i64, scratch_operands = 1 : i64, tpu.core_type = #tpu.core_type<tc>, window_params = [{transform_indices = @transform_0, window_bounds = array<i64: 1, 8, 256>}, {pipeline_mode = #tpu.pipeline_mode<synchronous>, transform_indices = @transform_1, window_bounds = array<i64: 8, 72>}, {pipeline_mode = #tpu.pipeline_mode<synchronous>, transform_indices = @transform_2, window_bounds = array<i64: 9, 1, 256>}, {pipeline_mode = #tpu.pipeline_mode<synchronous>, transform_indices = @transform_3, window_bounds = array<i64: 8, 1>}, {transform_indices = @transform_4, window_bounds = array<i64: 1, 8, 256>}]} {
    %c0 = arith.constant 0 : index
    %c0_0 = arith.constant 0 : index
    %c0_1 = arith.constant 0 : index
    %0 = vector.load %arg1[%c0, %c0_0, %c0_1] : memref<1x8x256xf32, #tpu.memory_space<vmem>>, vector<1x8x256xf32>
    %1 = vector.shape_cast %0 : vector<1x8x256xf32> to vector<8x256xf32>
    %c17_i32 = arith.constant 17 : i32
    %2 = tpu.dynamic_rotate %1 by %c17_i32 dim 1 : vector<8x256xf32>, i32 -> vector<8x256xf32>
    %c0_2 = arith.constant 0 : index
    %c0_3 = arith.constant 0 : index
    %c0_4 = arith.constant 0 : index
    %3 = vector.load %arg3[%c0_2, %c0_3, %c0_4] : memref<9x1x256xf32, #tpu.memory_space<vmem>>, vector<1x1x256xf32>
    %4 = vector.shape_cast %3 : vector<1x1x256xf32> to vector<1x256xf32>
    %5 = vector.broadcast %4 : vector<1x256xf32> to vector<8x256xf32>
    %6 = arith.mulf %2, %5 : vector<8x256xf32>
    %c0_5 = arith.constant 0 : index
    %c0_6 = arith.constant 0 : index
    %7 = vector.load %arg6[%c0_5, %c0_6] : memref<72x256xf32, #tpu.memory_space<vmem>>, vector<8x256xf32>
    tpu.vector_store %arg6[%c0_5, %c0_6], %6 {strides = array<i32>} : memref<72x256xf32, #tpu.memory_space<vmem>>, vector<8x256xf32>,
    %c16_i32 = arith.constant 16 : i32
    %8 = tpu.dynamic_rotate %1 by %c16_i32 dim 1 : vector<8x256xf32>, i32 -> vector<8x256xf32>
    %c1 = arith.constant 1 : index
    %c0_7 = arith.constant 0 : index
    %c0_8 = arith.constant 0 : index
    %9 = vector.load %arg3[%c1, %c0_7, %c0_8] : memref<9x1x256xf32, #tpu.memory_space<vmem>>, vector<1x1x256xf32>
    %10 = vector.shape_cast %9 : vector<1x1x256xf32> to vector<1x256xf32>
    %11 = vector.broadcast %10 : vector<1x256xf32> to vector<8x256xf32>
    %12 = arith.mulf %8, %11 : vector<8x256xf32>
    %c8 = arith.constant 8 : index
    %c0_9 = arith.constant 0 : index
    %13 = vector.load %arg6[%c8, %c0_9] : memref<72x256xf32, #tpu.memory_space<vmem>>, vector<8x256xf32>
    tpu.vector_store %arg6[%c8, %c0_9], %12 {strides = array<i32>} : memref<72x256xf32, #tpu.memory_space<vmem>>, vector<8x256xf32>,
    %c15_i32 = arith.constant 15 : i32
    %14 = tpu.dynamic_rotate %1 by %c15_i32 dim 1 : vector<8x256xf32>, i32 -> vector<8x256xf32>
    %c2 = arith.constant 2 : index
    %c0_10 = arith.constant 0 : index
    %c0_11 = arith.constant 0 : index
    %15 = vector.load %arg3[%c2, %c0_10, %c0_11] : memref<9x1x256xf32, #tpu.memory_space<vmem>>, vector<1x1x256xf32>
    %16 = vector.shape_cast %15 : vector<1x1x256xf32> to vector<1x256xf32>
    %17 = vector.broadcast %16 : vector<1x256xf32> to vector<8x256xf32>
    %18 = arith.mulf %14, %17 : vector<8x256xf32>
    %c16 = arith.constant 16 : index
    %c0_12 = arith.constant 0 : index
    %19 = vector.load %arg6[%c16, %c0_12] : memref<72x256xf32, #tpu.memory_space<vmem>>, vector<8x256xf32>
    tpu.vector_store %arg6[%c16, %c0_12], %18 {strides = array<i32>} : memref<72x256xf32, #tpu.memory_space<vmem>>, vector<8x256xf32>,
    %c1_i32 = arith.constant 1 : i32
    %20 = tpu.dynamic_rotate %1 by %c1_i32 dim 1 : vector<8x256xf32>, i32 -> vector<8x256xf32>
    %c3 = arith.constant 3 : index
    %c0_13 = arith.constant 0 : index
    %c0_14 = arith.constant 0 : index
    %21 = vector.load %arg3[%c3, %c0_13, %c0_14] : memref<9x1x256xf32, #tpu.memory_space<vmem>>, vector<1x1x256xf32>
    %22 = vector.shape_cast %21 : vector<1x1x256xf32> to vector<1x256xf32>
    %23 = vector.broadcast %22 : vector<1x256xf32> to vector<8x256xf32>
    %24 = arith.mulf %20, %23 : vector<8x256xf32>
    %c24 = arith.constant 24 : index
    %c0_15 = arith.constant 0 : index
    %25 = vector.load %arg6[%c24, %c0_15] : memref<72x256xf32, #tpu.memory_space<vmem>>, vector<8x256xf32>
    tpu.vector_store %arg6[%c24, %c0_15], %24 {strides = array<i32>} : memref<72x256xf32, #tpu.memory_space<vmem>>, vector<8x256xf32>,
    %c32 = arith.constant 32 : index
    %c0_16 = arith.constant 0 : index
    %26 = vector.load %arg6[%c32, %c0_16] : memref<72x256xf32, #tpu.memory_space<vmem>>, vector<8x256xf32>
    tpu.vector_store %arg6[%c32, %c0_16], %1 {strides = array<i32>} : memref<72x256xf32, #tpu.memory_space<vmem>>, vector<8x256xf32>,
    %c255_i32 = arith.constant 255 : i32
    %27 = tpu.dynamic_rotate %1 by %c255_i32 dim 1 : vector<8x256xf32>, i32 -> vector<8x256xf32>
    %c5 = arith.constant 5 : index
    %c0_17 = arith.constant 0 : index
    %c0_18 = arith.constant 0 : index
    %28 = vector.load %arg3[%c5, %c0_17, %c0_18] : memref<9x1x256xf32, #tpu.memory_space<vmem>>, vector<1x1x256xf32>
    %29 = vector.shape_cast %28 : vector<1x1x256xf32> to vector<1x256xf32>
    %30 = vector.broadcast %29 : vector<1x256xf32> to vector<8x256xf32>
    %31 = arith.mulf %27, %30 : vector<8x256xf32>
    %c40 = arith.constant 40 : index
    %c0_19 = arith.constant 0 : index
    %32 = vector.load %arg6[%c40, %c0_19] : memref<72x256xf32, #tpu.memory_space<vmem>>, vector<8x256xf32>
    tpu.vector_store %arg6[%c40, %c0_19], %31 {strides = array<i32>} : memref<72x256xf32, #tpu.memory_space<vmem>>, vector<8x256xf32>,
    %c241_i32 = arith.constant 241 : i32
    %33 = tpu.dynamic_rotate %1 by %c241_i32 dim 1 : vector<8x256xf32>, i32 -> vector<8x256xf32>
    %c6 = arith.constant 6 : index
    %c0_20 = arith.constant 0 : index
    %c0_21 = arith.constant 0 : index
    %34 = vector.load %arg3[%c6, %c0_20, %c0_21] : memref<9x1x256xf32, #tpu.memory_space<vmem>>, vector<1x1x256xf32>
    %35 = vector.shape_cast %34 : vector<1x1x256xf32> to vector<1x256xf32>
    %36 = vector.broadcast %35 : vector<1x256xf32> to vector<8x256xf32>
    %37 = arith.mulf %33, %36 : vector<8x256xf32>
    %c48 = arith.constant 48 : index
    %c0_22 = arith.constant 0 : index
    %38 = vector.load %arg6[%c48, %c0_22] : memref<72x256xf32, #tpu.memory_space<vmem>>, vector<8x256xf32>
    tpu.vector_store %arg6[%c48, %c0_22], %37 {strides = array<i32>} : memref<72x256xf32, #tpu.memory_space<vmem>>, vector<8x256xf32>,
    %c240_i32 = arith.constant 240 : i32
    %39 = tpu.dynamic_rotate %1 by %c240_i32 dim 1 : vector<8x256xf32>, i32 -> vector<8x256xf32>
    %c7 = arith.constant 7 : index
    %c0_23 = arith.constant 0 : index
    %c0_24 = arith.constant 0 : index
    %40 = vector.load %arg3[%c7, %c0_23, %c0_24] : memref<9x1x256xf32, #tpu.memory_space<vmem>>, vector<1x1x256xf32>
    %41 = vector.shape_cast %40 : vector<1x1x256xf32> to vector<1x256xf32>
    %42 = vector.broadcast %41 : vector<1x256xf32> to vector<8x256xf32>
    %43 = arith.mulf %39, %42 : vector<8x256xf32>
    %c56 = arith.constant 56 : index
    %c0_25 = arith.constant 0 : index
    %44 = vector.load %arg6[%c56, %c0_25] : memref<72x256xf32, #tpu.memory_space<vmem>>, vector<8x256xf32>
    tpu.vector_store %arg6[%c56, %c0_25], %43 {strides = array<i32>} : memref<72x256xf32, #tpu.memory_space<vmem>>, vector<8x256xf32>,
    %c239_i32 = arith.constant 239 : i32
    %45 = tpu.dynamic_rotate %1 by %c239_i32 dim 1 : vector<8x256xf32>, i32 -> vector<8x256xf32>
    %c8_26 = arith.constant 8 : index
    %c0_27 = arith.constant 0 : index
    %c0_28 = arith.constant 0 : index
    %46 = vector.load %arg3[%c8_26, %c0_27, %c0_28] : memref<9x1x256xf32, #tpu.memory_space<vmem>>, vector<1x1x256xf32>
    %47 = vector.shape_cast %46 : vector<1x1x256xf32> to vector<1x256xf32>
    %48 = vector.broadcast %47 : vector<1x256xf32> to vector<8x256xf32>
    %49 = arith.mulf %45, %48 : vector<8x256xf32>
    %c64 = arith.constant 64 : index
    %c0_29 = arith.constant 0 : index
    %50 = vector.load %arg6[%c64, %c0_29] : memref<72x256xf32, #tpu.memory_space<vmem>>, vector<8x256xf32>
    tpu.vector_store %arg6[%c64, %c0_29], %49 {strides = array<i32>} : memref<72x256xf32, #tpu.memory_space<vmem>>, vector<8x256xf32>,
    %c0_30 = arith.constant 0 : index
    %c0_31 = arith.constant 0 : index
    %51 = vector.load %arg2[%c0_30, %c0_31] : memref<8x72xf32, #tpu.memory_space<vmem>>, vector<8x72xf32>
    %c0_32 = arith.constant 0 : index
    %c0_33 = arith.constant 0 : index
    %52 = vector.load %arg6[%c0_32, %c0_33] : memref<72x256xf32, #tpu.memory_space<vmem>>, vector<72x256xf32>
    %cst = arith.constant dense<0.000000e+00> : vector<8x256xf32>
    %53 = tpu.matmul %51, %52, %cst {dimension_numbers = #tpu.dot_dimension_numbers<[1], [0], [0], [1], [0, 0, 1, 1], [], []>} : vector<8x72xf32>, vector<72x256xf32>, vector<8x256xf32> -> vector<8x256xf32>
    %c0_34 = arith.constant 0 : index
    %c0_35 = arith.constant 0 : index
    %54 = vector.load %arg4[%c0_34, %c0_35] : memref<8x1xf32, #tpu.memory_space<vmem>>, vector<8x1xf32>
    %55 = vector.broadcast %54 : vector<8x1xf32> to vector<8x256xf32>
    %56 = arith.addf %53, %55 : vector<8x256xf32>
    %cst_36 = arith.constant 0.000000e+00 : f32
    %57 = vector.broadcast %cst_36 : f32 to vector<8x256xf32>
    %58 = arith.maximumf %56, %57 : vector<8x256xf32>
    %c0_37 = arith.constant 0 : index
    %c0_38 = arith.constant 0 : index
    %c0_39 = arith.constant 0 : index
    %59 = vector.load %arg5[%c0_37, %c0_38, %c0_39] : memref<1x8x256xf32, #tpu.memory_space<vmem>>, vector<1x8x256xf32>
    %60 = vector.shape_cast %59 : vector<1x8x256xf32> to vector<8x256xf32>
    %61 = vector.shape_cast %58 : vector<8x256xf32> to vector<1x8x256xf32>
    tpu.vector_store %arg5[%c0_37, %c0_38, %c0_39], %61 {strides = array<i32>} : memref<1x8x256xf32, #tpu.memory_space<vmem>>, vector<1x8x256xf32>,
    return
  }
  func.func @transform_0(%arg0: i32) -> (i32, i32, i32) {
    %c0_i32 = arith.constant 0 : i32
    %c0_i32_0 = arith.constant 0 : i32
    %c0_i32_1 = arith.constant 0 : i32
    return %arg0, %c0_i32, %c0_i32_0 : i32, i32, i32
  }
  func.func @transform_1(%arg0: i32) -> (i32, i32) {
    %c0_i32 = arith.constant 0 : i32
    %c0_i32_0 = arith.constant 0 : i32
    %c0_i32_1 = arith.constant 0 : i32
    return %c0_i32, %c0_i32_0 : i32, i32
  }
  func.func @transform_2(%arg0: i32) -> (i32, i32, i32) {
    %c0_i32 = arith.constant 0 : i32
    %c0_i32_0 = arith.constant 0 : i32
    %c0_i32_1 = arith.constant 0 : i32
    %c0_i32_2 = arith.constant 0 : i32
    return %c0_i32, %c0_i32_0, %c0_i32_1 : i32, i32, i32
  }
  func.func @transform_3(%arg0: i32) -> (i32, i32) {
    %c0_i32 = arith.constant 0 : i32
    %c0_i32_0 = arith.constant 0 : i32
    %c0_i32_1 = arith.constant 0 : i32
    return %c0_i32, %c0_i32_0 : i32, i32
  }
  func.func @transform_4(%arg0: i32) -> (i32, i32, i32) {
    %c0_i32 = arith.constant 0 : i32
    %c0_i32_0 = arith.constant 0 : i32
    %c0_i32_1 = arith.constant 0 : i32
    return %arg0, %c0_i32, %c0_i32_0 : i32, i32, i32
  }
}

</mosaic_0001>

<bundles_post_ra>
// kernel: tpu_custom_call.1
= control target key start
LH: loop header
LB: loop body
LE: loop exit
PB: predicated region body
PF: predicated region fallthrough
CT: control target
= control target key end

     0   :  { %9 = vsyncpa [#allocation4], 0  ;;  %s1333_s0 = inlined_call_operand.hbm [shape: f32[2,8,256], index: 0, kind: input, shape index: {}]   ;;  %s1334_s1 = inlined_call_operand.hbm [shape: f32[8,72], index: 1, kind: input, shape index: {}]   ;;  %s1335_s2 = inlined_call_operand.hbm [shape: f32[9,1,256], index: 2, kind: input, shape index: {}]   ;;  %s1336_s3 = inlined_call_operand.hbm [shape: f32[8,1], index: 3, kind: input, shape index: {}]   ;;  %s1337_s4 = inlined_call_operand.hbm [shape: f32[2,8,256], index: 4, kind: output, shape index: {}]  }
   0x1   :  { %11 = vsyncpa [#allocation4 + $0x1], 0 }
   0x2   :  { %12 = vsyncpa [#allocation7], 0 }
   0x3   :  { %13 = vsyncpa [#allocation10], 0 }
   0x4   :  { %14 = vsyncpa [#allocation5], 0 }
   0x5   :  { %16 = vsyncpa [#allocation5 + $0x1], 0  ;;  %s1030_s15 = smov 0   ;;  %s1032_s16 = smov 0  }
   0x6   :  { %s1034_s17 = smov 0   ;;  %s1036_s18 = smov 0  }
   0x7 LB: > { %s1051_s19 = sadd.s32 4294967295, %s986_s18   ;;  %s669_s20 = sadd.s32 4294967294, %s986_s18   ;;  %s986_s18 = sphi %s1036_s18, %s1360_s18   ;;  %s982_s17 = sphi %s1034_s17, %s1359_s17   ;;  %s978_s16 = sphi %s1032_s16, %s1358_s16   ;;  %s974_s15 = sphi %s1030_s15, %s1357_s15  }
   0x8   : > { %p42_p0 = scmp.ne.s32.totalorder %s978_s16, %s974_s15  ;;  %p1338_p1 = scmp.eq.s32.totalorder %s1051_s19, 0 }
   0x9   : > { %p135_p3 = scmp.eq.s32.totalorder %s669_s20, 1  ;;  %p670_p5 = scmp.ge.s32.totalorder %s986_s18, 1 }
   0xa   : > { %p1060_p4 = por %p1338_p1, %p42_p0  ;;  %p142_p7 = scmp.lt.s32.totalorder %s986_s18, 3 }
   0xb   : > { %p1065_p6 = por %p135_p3, %p42_p0  ;;  %s988_s24 = smov [#allocation6]  }
   0xc   : > { %s1341_s21 = scalar_select %p1060_p4, 1, 0 }
   0xd   : > { %s1342_s22 = scalar_select %p1065_p6, 1, 0 }
   0xe   : > { %p1070_p8 = pnand %p670_p5, %p142_p7  ;;  %s155_s25 = sshll.u32 %s988_s24, 4  ;;  %s156_s25 = int_to_ptr.vmem [resolvable:$true] %s155_s25 }
   0xf   : > { %s989_s26 = smov [#allocation8]   ;;  %s990_s29 = smov [#allocation9]  }
  0x10   : > { %s1343_s23 = scalar_select %p1070_p8, 1, 0 }
  0x11   : > { %p724_p10 = pneg %p1070_p8  ;;  %s165_s27 = sshll.u32 %s989_s26, 4  ;;  %s1083_s27 = int_to_ptr.vmem [resolvable:$true] %s165_s27 }
  0x12   : > { %s1085_s30 = sshll.u32 %s990_s29, 4  ;;  %s798_s7 = scalar_lea.hbm %s1334_s1, 128  ;;  %s180_s30 = int_to_ptr.vmem [resolvable:$true] %s1085_s30 }
  0x13   : > { %p1079_p11 = pnand %p724_p10, %p1338_p1  ;;  %p799_p12 = scmp.ne.s32.totalorder %s1334_s1, %s798_s7 }
  0x14   : > { %p805_p5 = scmp.lt.u32.totalorder %s798_s7, %s1334_s1 }
  0x15   : > { %p1095_p13 = pneg %p1079_p11 }
  0x17   : > { %p801_p0 = pnand %p1095_p13, %p799_p12 }
  0x19   : > { %p802_p3 = pneg %p801_p0 }
  0x1b   : > { %p807_p7 = pnand %p805_p5, %p802_p3 }
  0x1d   : > { %810 = shalt.err (!%p807_p7)
}
  0x1e   : > { %s811_s13 = scalar_lea.vmem %s156_s25, 128  ;;  %p819_p2 = scmp.lt.s32.totalorder %s156_s25, %s156_s25 }
  0x1f   : > { %p812_p10 = scmp.ne.s32.totalorder %s156_s25, %s811_s13  ;;  %p820_p6 = scmp.lt.s32.totalorder %s811_s13, %s811_s13 }
  0x21   : > { %p814_p9 = pnand %p812_p10, %p1095_p13  ;;  %p821_p4 = por %p820_p6, %p819_p2 }
  0x23   : > { %p815_p1 = pneg %p814_p9 }
  0x25   : > { %p822_p8 = pnand %p821_p4, %p815_p1 }
  0x27   : > { %825 = shalt.err (!%p822_p8)
}
  0x28   : > { %727 = dma.hbm_to_vmem [thread:$0]  (!%p1079_p11), %s1334_s1, 128, %s156_s25, [#allocation7]  }
  0x29   : > { %s826_s29 = scalar_lea.hbm %s1335_s2, 288 }
  0x2a   : > { %p827_p9 = scmp.ne.s32.totalorder %s1335_s2, %s826_s29  ;;  %p833_p1 = scmp.lt.u32.totalorder %s826_s29, %s1335_s2 }
  0x2c   : > { %p829_p12 = pnand %p827_p9, %p1095_p13 }
  0x2e   : > { %p830_p2 = pneg %p829_p12 }
  0x30   : > { %p835_p4 = pnand %p833_p1, %p830_p2 }
  0x32   : > { %838 = shalt.err (!%p835_p4)
}
  0x33   : > { %s839_s25 = scalar_lea.vmem %s1083_s27, 288  ;;  %p847_p3 = scmp.lt.s32.totalorder %s1083_s27, %s1083_s27 }
  0x34   : > { %p840_p6 = scmp.ne.s32.totalorder %s1083_s27, %s839_s25  ;;  %p848_p5 = scmp.lt.s32.totalorder %s839_s25, %s839_s25 }
  0x36   : > { %p842_p8 = pnand %p840_p6, %p1095_p13  ;;  %p849_p7 = por %p848_p5, %p847_p3 }
  0x38   : > { %p843_p0 = pneg %p842_p8 }
  0x3a   : > { %p850_p10 = pnand %p849_p7, %p843_p0 }
  0x3c   : > { %853 = shalt.err (!%p850_p10)
}
  0x3d   : > { %s991_s9 = smov 32   ;;  %s992_s11 = smov 2  }
  0x3e   : > { %730 = dma.hbm_to_vmem [thread:$0]  (!%p1079_p11), %s1335_s2, 288, %s1083_s27, [#allocation7], %s991_s9, %s991_s9, %s992_s11  }
  0x3f   : > { %s854_s24 = scalar_lea.hbm %s1336_s3, 128 }
  0x40   : > { %p855_p9 = scmp.ne.s32.totalorder %s1336_s3, %s854_s24  ;;  %p861_p1 = scmp.lt.u32.totalorder %s854_s24, %s1336_s3 }
  0x42   : > { %p857_p12 = pnand %p855_p9, %p1095_p13 }
  0x44   : > { %p858_p2 = pneg %p857_p12 }
  0x46   : > { %p863_p4 = pnand %p861_p1, %p858_p2 }
  0x48   : > { %866 = shalt.err (!%p863_p4)
}
  0x49   : > { %s867_s7 = scalar_lea.vmem %s180_s30, 128  ;;  %p875_p3 = scmp.lt.s32.totalorder %s180_s30, %s180_s30 }
  0x4a   : > { %p868_p6 = scmp.ne.s32.totalorder %s180_s30, %s867_s7  ;;  %p876_p5 = scmp.lt.s32.totalorder %s867_s7, %s867_s7 }
  0x4c   : > { %p870_p8 = pnand %p868_p6, %p1095_p13  ;;  %p877_p7 = por %p876_p5, %p875_p3 }
  0x4e   : > { %p871_p0 = pneg %p870_p8 }
  0x50   : > { %p878_p10 = pnand %p877_p7, %p871_p0 }
  0x52   : > { %881 = shalt.err (!%p878_p10)
}
  0x53   : > { %733 = dma.hbm_to_vmem [thread:$0]  (!%p1079_p11), %s1336_s3, 128, %s180_s30, [#allocation10]  }
  0x54   : > { %s1154_s10 = sadd.s32 1, %s986_s18   ;;  %s29_s28 = sadd.s32 1, %s982_s17 }
  0x55   : > { %s26_s25 = ssub.s32 %s986_s18, %s1154_s10  ;;  %p36_p9 = scmp.ne.s32.totalorder %s982_s17, %s978_s16 }
  0x56   : > { %p27_p13 = scmp.eq.s32.totalorder %s26_s25, 0  ;;  %p37_p12 = scmp.eq.s32.totalorder %s986_s18, 0 }
  0x57   : > { %p745_p2 = scmp.lt.s32.totalorder %s986_s18, 2  ;;  %p1346_p4 = scmp.eq.s32.totalorder %s1051_s19, 1 }
  0x58   : > { %s1164_s9 = scalar_select %p27_p13, %s982_s17, %s29_s28  }
  0x59   : > { %p38_p1 = por %p37_p12, %p36_p9  ;;  %p1168_p6 = por %p1346_p4, %p36_p9 }
  0x5a   : > { %s190_s12 = sand.u32 1, %s982_s17   ;;  %s690_s13 = sshll.u32 %s986_s18, 8 }
  0x5b   : > { %s675_s30 = sshll.u32 %s190_s12, 4  ;;  %s1177_s24 = scalar_lea.hbm %s1333_s0, %s690_s13 }
  0x5c   : > { %s194_s26 = scalar_lea.vmem [#allocation3], %s675_s30  ;;  %p1179_p11 = pnand %p745_p2, %p38_p1 }
  0x5d   : > { %s202_s29 = sshll.u32 %s194_s26, 4  ;;  %s191_s6 = scalar_lea.sflag [#allocation4], %s190_s12  ;;  %s1183_s29 = int_to_ptr.vmem [resolvable:$true] %s202_s29 }
  0x5e   : > { %s882_s7 = scalar_lea.hbm %s1177_s24, 256  ;;  %p884_p0 = pneg %p1179_p11 }
  0x5f   : > { %p883_p8 = scmp.ne.s32.totalorder %s1177_s24, %s882_s7  ;;  %s887_s25 = scalar_lea.hbm %s1333_s0, 512 }
  0x60   : > { %p888_p7 = scmp.lt.u32.totalorder %s1177_s24, %s1333_s0  ;;  %p889_p10 = scmp.lt.u32.totalorder %s887_s25, %s882_s7 }
  0x61   : > { %p885_p3 = pnand %p884_p0, %p883_p8  ;;  %p891_p9 = scmp.lt.u32.totalorder %s882_s7, %s1177_s24 }
  0x62   : > { %p890_p13 = por %p889_p10, %p888_p7 }
  0x63   : > { %p886_p5 = pneg %p885_p3 }
  0x64   : > { %p892_p12 = por %p891_p9, %p890_p13 }
  0x66   : > { %p893_p2 = pnand %p892_p12, %p886_p5 }
  0x68   : > { %896 = shalt.err (!%p893_p2)
}
  0x69   : > { %s897_s12 = scalar_lea.vmem %s1183_s29, 256  ;;  %s993_s30 = smov [#allocation3]  }
  0x6a   : > { %p898_p1 = scmp.ne.s32.totalorder %s1183_s29, %s897_s12  ;;  %s902_s14 = sshll.u32 %s993_s30, 4  ;;  %s903_s14 = int_to_ptr.vmem [resolvable:$false] %s902_s14 }
  0x6b   : > { %s904_s20 = scalar_lea.vmem %s903_s14, 512  ;;  %p905_p3 = scmp.lt.s32.totalorder %s1183_s29, %s903_s14 }
  0x6c   : > { %p900_p4 = pnand %p898_p1, %p884_p0  ;;  %p906_p7 = scmp.lt.s32.totalorder %s904_s20, %s897_s12 }
  0x6e   : > { %p901_p8 = pneg %p900_p4  ;;  %p907_p10 = por %p906_p7, %p905_p3 }
  0x70   : > { %p908_p13 = pnand %p907_p10, %p901_p8 }
  0x72   : > { %911 = shalt.err (!%p908_p13)
}
  0x73   : > { %737 = dma.hbm_to_vmem [thread:$0]  (!%p1179_p11), %s1177_s24, 256, %s1183_s29, %s191_s6  }
  0x74   : > { %p1349_p5 = scmp.ne.s32.totalorder %s1343_s23, 0 }
  0x75   : > { %s1213_s26 = sand.u32 (!%p1349_p5), 1, %s978_s16   ;;  %p1350_p0 = scmp.ne.s32.totalorder (!%p1349_p5), %s1341_s21, 0 }
  0x76   : > { %211 = sbr.rel (%p1349_p5) target bundleno = 515 (0x203), region = 36  ;;  %s679_s7 = sshll.u32 (!%p1349_p5), %s1213_s26, 4 }
  0x77   : > { %s214_s27 = scalar_lea.sflag (!%p1349_p5), [#allocation4], %s1213_s26  ;;  %s217_s8 = scalar_lea.vmem (!%p1349_p5), [#allocation3], %s679_s7 }
  0x7d   : > { %957 = dma.done.wait (%p1350_p0), %s214_s27, 256  }
  0x7e   : > { %959 = vsyncadd (%p1350_p0), %s214_s27, 4294967040  ;;  %p1351_p11 = scmp.eq.s32.totalorder %s1051_s19, 0 }
  0x80   : > { %961 = dma.done.wait (%p1351_p11), [#allocation7], 416   ;;  %p1352_p9 = pmov %p1351_p11 }
  0x82   : > { %963 = vsyncadd (%p1352_p9), [#allocation7], 4294966880  ;;  %p1353_p12 = pmov %p1352_p9 }
  0x83   : > { %p1354_p2 = pmov %p1352_p9 }
  0x84   : > { %965 = dma.done.wait (%p1353_p12), [#allocation10], 128  }
  0x85   : > { %967 = vsyncadd (%p1354_p2), [#allocation10], 4294967168  ;;  %v1231_v0 = vld [vmem:[%s217_s8] sm:$0xff]  ;;  %s994_s23 = smov 16   ;;  %s995_s24 = smov 17   ;;  %v1235_v1 = vld [vmem:[%s217_s8 + $0x8] sm:$0xff]  ;;  %v260_v5 = vlaneseq }
  0x86   : > { %281 = vrot.lane.b32.xlu1 %v1231_v0, %s994_s23  ;;  %256 = vrot.lane.b32.xlu0 %v1231_v0, %s995_s24  ;;  %s996_s21 = smov 15   ;;  %s997_s29 = smov 1   ;;  %v1000_v2 = vmov 0.0   ;;  %v1001_v3 = vmov 0   ;;  %v470_v4 = vld [vmem:[#allocation9] sm:$0xff]  ;;  %vm476_vm8 = vcmask 588800  }
  0x87   : > { %s998_s5 = smov 127   ;;  %s999_s6 = smov 113   ;;  %544 = vmatprep.mubr.f32.mxu0 %v1000_v2  ;;  %797 = vset.pattern.permute.xlu0 %v1001_v3  ;;  %v268_v6 = vshrl.u32 %v260_v5, 7  ;;  %v1251_v7 = vand.u32 127, %v260_v5  ;;  %v289_v10 = vld [vmem:[#allocation8 + $0x2] sm:$0x3] }
  0x88   : > { %s1002_s25 = smov 112   ;;  %s1003_s28 = smov 111   ;;  %v265_v11 = vld [vmem:[#allocation8] sm:$0x3]  ;;  %v313_v28 = vld [vmem:[#allocation8 + $0x4] sm:$0x3] }
  0x89   : > { %v1253_v8 = vsub.s32 0, %v268_v6  ;;  %v1255_v9 = vsub.s32 1, %v268_v6  ;;  %vm285_vm0 = vcmp.lt.s32.totalorder %v1251_v7, 16  ;;  %vm262_vm1 = vcmp.lt.s32.totalorder %v1251_v7, 17  ;;  %v337_v29 = vld [vmem:[#allocation8 + $0x6] sm:$0x3] }
  0x8a   : > { %283 = vrot.lane.b32.xlu1 %v1235_v1, %s994_s23  ;;  %258 = vrot.lane.b32.xlu0 %v1235_v1, %s995_s24  ;;  %vm309_vm2 = vcmp.lt.s32.totalorder %v1251_v7, 15  ;;  %vm333_vm3 = vcmp.lt.s32.totalorder %v1251_v7, 1  ;;  %v363_v38 = vld [vmem:[#allocation8 + $0xa] sm:$0x3]  ;;  %vm359_vm4 = vcmp.lt.s32.totalorder %v1251_v7, 127  ;;  %vm383_vm5 = vcmp.lt.s32.totalorder %v1251_v7, 113 }
  0x8b   : > { %v294_v14 = vrot.slane %v289_v10, %v1253_v8  ;;  %v270_v15 = vrot.slane %v265_v11, %v1253_v8  ;;  %v274_v16 = vrot.slane %v265_v11, %v1255_v9  ;;  %v298_v17 = vrot.slane %v289_v10, %v1255_v9  ;;  %v387_v59 = vld [vmem:[#allocation8 + $0xc] sm:$0x3]  ;;  %v411_v60 = vld [vmem:[#allocation8 + $0xe] sm:$0x3]  ;;  %v435_v10 = vld [vmem:[#allocation8 + $0x10] sm:$0x3] }
  0x8c   : > { %v318_v34 = vrot.slane %v313_v28, %v1253_v8  ;;  %v322_v35 = vrot.slane %v313_v28, %v1255_v9  ;;  %v342_v36 = vrot.slane %v337_v29, %v1253_v8  ;;  %v346_v37 = vrot.slane %v337_v29, %v1255_v9  ;;  %s691_s13 = sshll.u32 %s1051_s19, 8  ;;  %s253_s12 = scalar_lea.vmem [#allocation11], %s679_s7 }
  0x8d   : > { %v368_v45 = vrot.slane %v363_v38, %v1253_v8  ;;  %v372_v46 = vrot.slane %v363_v38, %v1255_v9  ;;  %v392_v3 = vrot.slane %v387_v59, %v1253_v8  ;;  %vm407_vm6 = vcmp.lt.s32.totalorder %v1251_v7, 112  ;;  %s570_s30 = sshll.u32 %s253_s12, 4  ;;  %s1289_s27 = scalar_lea.hbm %s1337_s4, %s691_s13  ;;  %s1291_s30 = int_to_ptr.vmem [resolvable:$true] %s570_s30 }
  0x8e   : > { %307 = vrot.lane.b32.xlu1 %v1235_v1, %s996_s21  ;;  %305 = vrot.lane.b32.xlu0 %v1231_v0, %s996_s21  ;;  %v416_v5 = vrot.slane %v411_v60, %v1253_v8  ;;  %v420_v6 = vrot.slane %v411_v60, %v1255_v9  ;;  %vm431_vm7 = vcmp.lt.s32.totalorder %v1251_v7, 111  ;;  %v451_v7 = vld [vmem:[#allocation6] sm:$0xff]  ;;  %s556_s8 = scalar_lea.sflag [#allocation5], %s1213_s26  ;;  %s912_s19 = scalar_lea.vmem %s1291_s30, 256 }
  0x8f   : > { %p913_p1 = scmp.ne.s32.totalorder %s1291_s30, %s912_s19  ;;  %s1004_s7 = smov [#allocation11]  }
  0x90   : > { %s916_s23 = sshll.u32 %s1004_s7, 4  ;;  %s917_s23 = int_to_ptr.vmem [resolvable:$false] %s916_s23 }
  0x91   : > { %p914_p4 = pnand %p913_p1, %p1168_p6  ;;  %s918_s24 = scalar_lea.vmem %s917_s23, 512 }
  0x92   : > { %331 = vrot.lane.b32.xlu1 %v1235_v1, %s997_s29  ;;  %329 = vrot.lane.b32.xlu0 %v1231_v0, %s997_s29  ;;  %p919_p3 = scmp.lt.s32.totalorder %s1291_s30, %s917_s23  ;;  %p920_p7 = scmp.lt.s32.totalorder %s918_s24, %s912_s19 }
  0x93   : > { %p915_p8 = pneg %p914_p4 }
  0x94   : > { %p921_p10 = por %p920_p7, %p919_p3 }
  0x96   : > { %357 = vrot.lane.b32.xlu1 %v1235_v1, %s998_s5  ;;  %355 = vrot.lane.b32.xlu0 %v1231_v0, %s998_s5  ;;  %p922_p13 = pnand %p921_p10, %p915_p8 }
  0x9a   : > { %381 = vrot.lane.b32.xlu1 %v1235_v1, %s999_s6  ;;  %379 = vrot.lane.b32.xlu0 %v1231_v0, %s999_s6 }
  0x9e   : > { %405 = vrot.lane.b32.xlu1 %v1235_v1, %s1002_s25  ;;  %403 = vrot.lane.b32.xlu0 %v1231_v0, %s1002_s25 }
  0xa2   : > { %429 = vrot.lane.b32.xlu1 %v1235_v1, %s1003_s28  ;;  %427 = vrot.lane.b32.xlu0 %v1231_v0, %s1003_s28 }
  0xa6   : > { %473 = vperm.xlu0 %797, %v470_v4   ;;  %v396_v4 = vrot.slane %v387_v59, %v1255_v9 }
  0xf8   : > { %v282_v12 = vpop.permute.xlu1 %281  ;;  %v257_v13 = vpop.permute.xlu0 %256 }
  0xfc   : > { %v284_v18 = vpop.permute.xlu1 %283  ;;  %v259_v19 = vpop.permute.xlu0 %258 }
  0xfd   : > { %v286_v20 = vsel %vm285_vm0, %v282_v12, %v284_v18  ;;  %v287_v21 = vsel %vm285_vm0, %v284_v18, %v282_v12  ;;  %v263_v22 = vsel %vm262_vm1, %v257_v13, %v259_v19  ;;  %v264_v23 = vsel %vm262_vm1, %v259_v19, %v257_v13 }
  0xfe   : > { %v301_v24 = vmul.f32 %v294_v14, %v287_v21  ;;  %v277_v25 = vmul.f32 %v270_v15, %v264_v23  ;;  %v278_v26 = vmul.f32 %v274_v16, %v263_v22  ;;  %v302_v27 = vmul.f32 %v298_v17, %v286_v20 }
  0xff   : > { %v440_v20 = vrot.slane %v435_v10, %v1253_v8 }
 0x100   : > { %v308_v30 = vpop.permute.xlu1 %307  ;;  %v306_v31 = vpop.permute.xlu0 %305  ;;  %v692_v32 = vpack.c.bf16 %v302_v27, %v278_v26  ;;  %v694_v33 = vpack.c.bf16 %v301_v24, %v277_v25 }
 0x101   : > { %v310_v39 = vsel %vm309_vm2, %v306_v31, %v308_v30  ;;  %v311_v40 = vsel %vm309_vm2, %v308_v30, %v306_v31 }
 0x102   : > { %693 = vmatprep.subr.bf16.mxu0 %v692_v32  ;;  %v325_v47 = vmul.f32 %v318_v34, %v311_v40  ;;  %v326_v48 = vmul.f32 %v322_v35, %v310_v39 }
 0x103   : > { %695 = vmatpush1.bf16.msra.mxu0 %v694_v33 }
 0x104   : > { %v332_v41 = vpop.permute.xlu1 %331  ;;  %v330_v42 = vpop.permute.xlu0 %329 }
 0x105   : > { %v334_v43 = vsel %vm333_vm3, %v330_v42, %v332_v41  ;;  %v335_v44 = vsel %vm333_vm3, %v332_v41, %v330_v42 }
 0x106   : > { %v349_v49 = vmul.f32 %v342_v36, %v335_v44  ;;  %v350_v50 = vmul.f32 %v346_v37, %v334_v43 }
 0x108   : > { %v358_v51 = vpop.permute.xlu1 %357  ;;  %v356_v52 = vpop.permute.xlu0 %355  ;;  %v696_v53 = vpack.c.bf16 %v350_v50, %v326_v48  ;;  %v698_v54 = vpack.c.bf16 %v349_v49, %v325_v47 }
 0x109   : > { %v360_v55 = vsel %vm359_vm4, %v356_v52, %v358_v51  ;;  %v361_v56 = vsel %vm359_vm4, %v358_v51, %v356_v52 }
 0x10a   : > { %v375_v57 = vmul.f32 %v368_v45, %v360_v55  ;;  %v376_v58 = vmul.f32 %v372_v46, %v361_v56  ;;  %697 = vmatprep.subr.bf16.mxu0 %v696_v53 }
 0x10b   : > { %699 = vmatpush1.bf16.msra.mxu0 %v698_v54 }
 0x10c   : > { %v382_v61 = vpop.permute.xlu1 %381  ;;  %v380_v62 = vpop.permute.xlu0 %379  ;;  %v700_v63 = vpack.c.bf16 %v376_v58, %v1235_v1  ;;  %v702_v2 = vpack.c.bf16 %v375_v57, %v1231_v0  ;;  %v444_v0 = vrot.slane %v435_v10, %v1255_v9 }
 0x10d   : > { %v384_v11 = vsel %vm383_vm5, %v380_v62, %v382_v61  ;;  %v385_v12 = vsel %vm383_vm5, %v382_v61, %v380_v62 }
 0x10e   : > { %701 = vmatprep.subr.bf16.mxu0 %v700_v63  ;;  %v399_v16 = vmul.f32 %v392_v3, %v384_v11  ;;  %v400_v17 = vmul.f32 %v396_v4, %v385_v12 }
 0x10f   : > { %703 = vmatpush1.bf16.msra.mxu0 %v702_v2 }
 0x110   : > { %v406_v13 = vpop.permute.xlu1 %405  ;;  %v404_v14 = vpop.permute.xlu0 %403 }
 0x111   : > { %v408_v1 = vsel %vm407_vm6, %v404_v14, %v406_v13  ;;  %v409_v15 = vsel %vm407_vm6, %v406_v13, %v404_v14 }
 0x112   : > { %v423_v18 = vmul.f32 %v416_v5, %v408_v1  ;;  %v424_v19 = vmul.f32 %v420_v6, %v409_v15 }
 0x114   : > { %v430_v21 = vpop.permute.xlu1 %429  ;;  %v704_v22 = vpack.c.bf16 %v424_v19, %v400_v17  ;;  %v428_v23 = vpop.permute.xlu0 %427  ;;  %v706_v24 = vpack.c.bf16 %v423_v18, %v399_v16 }
 0x115   : > { %v432_v25 = vsel %vm431_vm7, %v428_v23, %v430_v21  ;;  %v433_v26 = vsel %vm431_vm7, %v430_v21, %v428_v23 }
 0x116   : > { %705 = vmatprep.subr.bf16.mxu0 %v704_v22  ;;  %v448_v27 = vmul.f32 %v444_v0, %v433_v26  ;;  %v447_v28 = vmul.f32 %v440_v20, %v432_v25 }
 0x117   : > { %707 = vmatpush1.bf16.msra.mxu0 %v706_v24 }
 0x118   : > { %496 = vmatprep.subr.mxu0 %v448_v27 }
 0x11b   : > { %497 = vmatpush1.msra.mxu0 %v447_v28 }
 0x11c   : > { %684 = vmatmul.mubr.msk.f32.vlgmr.msra.gmra.mrb[0].mxu0 %vm476_vm8, %v451_v7 }
 0x125   : > { %v474_v9 = vpop.permute.xlu0 %473 }
 0x1ef   : > { %v546_v8 = vpop.f32.mrb[0].mxu0 }
 0x1f0   : > { %v547_v29 = vadd.f32 %v546_v8, %v474_v9  ;;  %v548_v30 = vpop.f32.mrb[1].mxu0 }
 0x1f1   : > { %v549_v31 = vadd.f32 %v548_v30, %v474_v9 }
 0x1f2   : > { %v551_v32 = vmax.f32 %v547_v29, 0.0 }
 0x1f3   : > { %v552_v33 = vmax.f32 %v549_v31, 0.0 }
 0x1f4   : > { %553 = vst [vmem:[%s253_s12] sm:$0xff] %v551_v32 }
 0x1f5   : > { %554 = vst [vmem:[%s253_s12 + $0x8] sm:$0xff] %v552_v33 }
 0x1f6   : > { %925 = shalt.err (!%p922_p13)
}
 0x1f7   : > { %s926_s26 = scalar_lea.hbm %s1289_s27, 256  ;;  %s930_s5 = scalar_lea.hbm %s1337_s4, 512 }
 0x1f8   : > { %p927_p5 = scmp.ne.s32.totalorder %s1289_s27, %s926_s26  ;;  %p931_p9 = scmp.lt.u32.totalorder %s1289_s27, %s1337_s4 }
 0x1f9   : > { %p932_p12 = scmp.lt.u32.totalorder %s930_s5, %s926_s26  ;;  %p934_p1 = scmp.lt.u32.totalorder %s926_s26, %s1289_s27 }
 0x1fa   : > { %p928_p0 = pnand %p927_p5, %p1168_p6 }
 0x1fb   : > { %p933_p2 = por %p932_p12, %p931_p9 }
 0x1fc   : > { %p929_p11 = pneg %p928_p0 }
 0x1fd   : > { %p935_p4 = por %p934_p1, %p933_p2 }
 0x1ff   : > { %p936_p8 = pnand %p935_p4, %p929_p11 }
 0x201   : > { %939 = shalt.err (!%p936_p8)
}
 0x202   : > { %722 = dma.vmem_to_hbm [thread:$0]  (%p1168_p6), %s1291_s30, 256, %s1289_s27, %s556_s8  }
 0x203 PF: > { %s582_s28 = sand.u32 1, %s974_s15   ;;  %p1355_p3 = scmp.ne.s32.totalorder %s1342_s22, 0 }
 0x204   : > { %p1356_p7 = scmp.ge.s32.totalorder %s986_s18, 2  ;;  %s583_s13 = scalar_lea.sflag [#allocation5], %s582_s28 }
 0x206   : > { %p739_p10 = pnand %p1356_p7, %p1355_p3 }
 0x208   : > { %969 = dma.done.wait (!%p739_p10), %s583_s13, 256  }
 0x209   : > { %971 = vsyncadd (!%p739_p10), %s583_s13, 4294967040  ;;  %p19_p13 = scmp.ge.s32.totalorder %s1154_s10, 4   ;;  %s1357_s15 = smov %s978_s16 }
 0x20a   : > { %s1358_s16 = smov %s982_s17  ;;  %s1359_s17 = smov %s1164_s9 }
 0x20b   : > { %s1360_s18 = smov %s1154_s10  ;;  %21 = sbr.rel (!%p19_p13) target bundleno = 7 (0x7), region = 100 }
 0x212   :  { %588 = vsyncpa [#allocation4], 1 }
 0x213   :  { %590 = vsyncpa [#allocation4 + $0x1], 1 }
 0x214   :  { %591 = vsyncpa [#allocation7], 1 }
 0x215   :  { %592 = vsyncpa [#allocation10], 1 }
 0x216   :  { %593 = vsyncpa [#allocation5], 1 }
 0x217   :  { %595 = vsyncpa [#allocation5 + $0x1], 1 }

</bundles_post_ra>
